<compile_context>
chip_gen: v5e
topology: v5e:2x2
jax: 0.10.0
libtpu: 0.0.40
codegen_flags: <defaults>
</compile_context>

<pallas_src>
import functools
import math

import jax
import jax.numpy as jnp
from jax.experimental import pallas as pl
from jax.experimental.pallas import tpu as pltpu


# ----------------------------------------------------------------------------
# Fused kernel: all RNN layers + final Linear in a single invocation.
#
# refs layout (inputs..., outputs..., scratch...):
#   refs[0]              : x2d   (S*B, D)   time-major flattened input
#   refs[1 + 3l + 0]     : W_ih^T (D_in, H) for layer l
#   refs[1 + 3l + 1]     : W_hh^T (H, H)    for layer l
#   refs[1 + 3l + 2]     : bias   (1, H)    = b_ih + b_hh for layer l
#   refs[1 + 3L + 0]     : W_out^T (H, O)
#   refs[1 + 3L + 1]     : b_out   (1, O)
#   refs[1 + 3L + 2]     : out     (B, O)
#   refs[1 + 3L + 3]     : pg_scr  (S*B, H) VMEM scratch (hoisted pregates)
#   refs[1 + 3L + 4]     : act_scr (S*B, H) VMEM scratch (layer output sequence)
# ----------------------------------------------------------------------------
def _rnn_fused_kernel(*refs, seq_len, batch, hidden_size, num_layers):
    x2d_ref = refs[0]
    w_out_ref = refs[1 + 3 * num_layers]
    b_out_ref = refs[2 + 3 * num_layers]
    out_ref = refs[3 + 3 * num_layers]
    pg_scr = refs[4 + 3 * num_layers]
    act_scr = refs[5 + 3 * num_layers]

    B, S = batch, seq_len

    h = jnp.zeros((B, hidden_size), jnp.float32)
    for layer in range(num_layers):
        w_ih_ref = refs[1 + 3 * layer]
        w_hh_ref = refs[2 + 3 * layer]
        b_ref = refs[3 + 3 * layer]

        # ---- Hoisted, time-independent input projection: one tall matmul ----
        # rows of `inp` are time-major: row t*B + b  <->  (timestep t, batch b)
        inp = x2d_ref[...] if layer == 0 else act_scr[...]
        pg_scr[...] = (
            jnp.dot(inp, w_ih_ref[...], preferred_element_type=jnp.float32)
            + b_ref[...]
        )

        # Keep recurrent weight in registers across the unrolled time loop.
        w_hh = w_hh_ref[...]

        # ---- Serial recurrence: only h @ W_hh^T per step (unrolled) ----
        h = jnp.zeros((B, hidden_size), jnp.float32)
        for t in range(S):
            g = pg_scr[pl.ds(t * B, B), :]                       # (B, H)
            h = jnp.tanh(
                g + jnp.dot(h, w_hh, preferred_element_type=jnp.float32)
            )
            if layer + 1 < num_layers:
                # Store this layer's output time-majorly for the next layer's
                # hoisted projection (stays in VMEM; never touches HBM).
                act_scr[pl.ds(t * B, B), :] = h

    # ---- Final Linear on the last timestep of the top layer ----
    out_ref[...] = (
        jnp.dot(h, w_out_ref[...], preferred_element_type=jnp.float32)
        + b_out_ref[...]
    ).astype(out_ref.dtype)


# ----------------------------------------------------------------------------
# Wrapper: builds specs for a variable number of layers and calls the kernel.
# ----------------------------------------------------------------------------
def rnn_forward(x, params, *, hidden_size, num_layers):
    """x: (batch, seq, input_size) — batch_first, like the PyTorch module."""
    B, S, D = x.shape
    H = hidden_size
    w_out_t, b_out = params["out"]
    O = w_out_t.shape[1]

    # One-time batch-first -> time-major flatten of the raw input (plain JAX);
    # everything else runs inside the single fused Pallas call.
    x2d = jnp.transpose(x, (1, 0, 2)).reshape(S * B, D)

    inputs = [x2d]
    in_specs = [pl.BlockSpec((S * B, D), lambda: (0, 0))]
    for layer in range(num_layers):
        w_ih_t, w_hh_t, b = params[f"layer{layer}"]
        d_in = w_ih_t.shape[0]
        inputs += [w_ih_t, w_hh_t, b]
        in_specs += [
            pl.BlockSpec((d_in, H), lambda: (0, 0)),
            pl.BlockSpec((H, H), lambda: (0, 0)),
            pl.BlockSpec((1, H), lambda: (0, 0)),
        ]
    inputs += [w_out_t, b_out]
    in_specs += [
        pl.BlockSpec((H, O), lambda: (0, 0)),
        pl.BlockSpec((1, O), lambda: (0, 0)),
    ]

    kernel = functools.partial(
        _rnn_fused_kernel,
        seq_len=S, batch=B, hidden_size=H, num_layers=num_layers,
    )
    return pl.pallas_call(
        kernel,
        out_shape=jax.ShapeDtypeStruct((B, O), jnp.float32),
        in_specs=in_specs,
        out_specs=pl.BlockSpec((B, O), lambda: (0, 0)),
        scratch_shapes=[
            pltpu.VMEM((S * B, H), jnp.float32),   # hoisted pregates
            pltpu.VMEM((S * B, H), jnp.float32),   # inter-layer activations
        ],
    )(*inputs)
    # TODO(synk): for large H on v6e/v7x, cast matmul operands to bf16 (keep
    # f32 gate math) and set vmem_limit_bytes / tile the H axis of W_hh.


# ----------------------------------------------------------------------------
# Pure-JAX reference (for correctness check only)
# ----------------------------------------------------------------------------
def rnn_reference(x, params, *, hidden_size, num_layers):
    B, S, _ = x.shape
    h_seq = x
    for layer in range(num_layers):
        w_ih_t, w_hh_t, b = params[f"layer{layer}"]
        h = jnp.zeros((B, hidden_size), jnp.float32)
        outs = []
        for t in range(S):
            h = jnp.tanh(h_seq[:, t, :] @ w_ih_t + h @ w_hh_t + b)
            outs.append(h)
        h_seq = jnp.stack(outs, axis=1)
    w_out_t, b_out = params["out"]
    return h_seq[:, -1, :] @ w_out_t + b_out


# ----------------------------------------------------------------------------
# Parameter init mimicking PyTorch U(-1/sqrt(H), 1/sqrt(H)); weights stored
# pre-transposed, biases combined (b_ih + b_hh) as used by the kernel.
# ----------------------------------------------------------------------------
def init_params(key, input_size, hidden_size, num_layers, output_size):
    params = {}
    k = 1.0 / math.sqrt(hidden_size)
    for layer in range(num_layers):
        d_in = input_size if layer == 0 else hidden_size
        key, k1, k2, k3, k4 = jax.random.split(key, 5)
        w_ih = jax.random.uniform(k1, (hidden_size, d_in), jnp.float32, -k, k)
        w_hh = jax.random.uniform(k2, (hidden_size, hidden_size), jnp.float32, -k, k)
        b_ih = jax.random.uniform(k3, (hidden_size,), jnp.float32, -k, k)
        b_hh = jax.random.uniform(k4, (hidden_size,), jnp.float32, -k, k)
        params[f"layer{layer}"] = (
            w_ih.T,                                     # (d_in, H)
            w_hh.T,                                     # (H, H)
            (b_ih + b_hh).reshape(1, hidden_size),      # (1, H)
        )
    key, k1, k2 = jax.random.split(key, 3)
    w_out = jax.random.uniform(k1, (output_size, hidden_size), jnp.float32, -k, k)
    b_out = jax.random.uniform(k2, (output_size,), jnp.float32, -k, k)
    params["out"] = (w_out.T, b_out.reshape(1, output_size))
    return params


if __name__ == "__main__":
    batch, seq = 2, 8
    input_size, hidden_size, num_layers, output_size = 16, 32, 2, 4

    key = jax.random.PRNGKey(0)
    key, kx = jax.random.split(key)
    x = jax.random.normal(kx, (batch, seq, input_size), jnp.float32)

    params = init_params(key, input_size, hidden_size, num_layers, output_size)

    fwd = jax.jit(functools.partial(rnn_forward, hidden_size=hidden_size,
                                    num_layers=num_layers))
    out = fwd(x, params)
    jax.block_until_ready(out)
    assert out.shape == (batch, output_size)

    ref = rnn_reference(x, params, hidden_size=hidden_size,
                        num_layers=num_layers)
    assert jnp.allclose(out, ref, rtol=5e-3, atol=5e-3), (out, ref)

    print("KERNEL_OK")
</pallas_src>

<mosaic_0001>
module attributes {stable_mosaic.version = 11 : i64} {
  func.func @_rnn_fused_kernel(%arg0: memref<16x16xf32, #tpu.memory_space<vmem>>, %arg1: memref<16x32xf32, #tpu.memory_space<vmem>>, %arg2: memref<32x32xf32, #tpu.memory_space<vmem>>, %arg3: memref<1x32xf32, #tpu.memory_space<vmem>>, %arg4: memref<32x32xf32, #tpu.memory_space<vmem>>, %arg5: memref<32x32xf32, #tpu.memory_space<vmem>>, %arg6: memref<1x32xf32, #tpu.memory_space<vmem>>, %arg7: memref<32x4xf32, #tpu.memory_space<vmem>>, %arg8: memref<1x4xf32, #tpu.memory_space<vmem>>, %arg9: memref<2x4xf32, #tpu.memory_space<vmem>>, %arg10: memref<16x32xf32, #tpu.memory_space<vmem>>, %arg11: memref<16x32xf32, #tpu.memory_space<vmem>>) attributes {dimension_semantics = [], scalar_prefetch = 0 : i64, scratch_operands = 2 : i64, tpu.core_type = #tpu.core_type<tc>} {
    %c0 = arith.constant 0 : index
    %c0_0 = arith.constant 0 : index
    %0 = vector.load %arg0[%c0, %c0_0] : memref<16x16xf32, #tpu.memory_space<vmem>>, vector<16x16xf32>
    %c0_1 = arith.constant 0 : index
    %c0_2 = arith.constant 0 : index
    %1 = vector.load %arg1[%c0_1, %c0_2] : memref<16x32xf32, #tpu.memory_space<vmem>>, vector<16x32xf32>
    %cst = arith.constant dense<0.000000e+00> : vector<16x32xf32>
    %2 = tpu.matmul %0, %1, %cst {dimension_numbers = #tpu.dot_dimension_numbers<[1], [0], [0], [1], [0, 0, 1, 1], [], []>} : vector<16x16xf32>, vector<16x32xf32>, vector<16x32xf32> -> vector<16x32xf32>
    %c0_3 = arith.constant 0 : index
    %c0_4 = arith.constant 0 : index
    %3 = vector.load %arg3[%c0_3, %c0_4] : memref<1x32xf32, #tpu.memory_space<vmem>>, vector<1x32xf32>
    %4 = vector.broadcast %3 : vector<1x32xf32> to vector<16x32xf32>
    %5 = arith.addf %2, %4 : vector<16x32xf32>
    %c0_5 = arith.constant 0 : index
    %c0_6 = arith.constant 0 : index
    %6 = vector.load %arg10[%c0_5, %c0_6] : memref<16x32xf32, #tpu.memory_space<vmem>>, vector<16x32xf32>
    tpu.vector_store %arg10[%c0_5, %c0_6], %5 {strides = array<i32>} : memref<16x32xf32, #tpu.memory_space<vmem>>, vector<16x32xf32>,
    %c0_7 = arith.constant 0 : index
    %c0_8 = arith.constant 0 : index
    %7 = vector.load %arg2[%c0_7, %c0_8] : memref<32x32xf32, #tpu.memory_space<vmem>>, vector<32x32xf32>
    %cst_9 = arith.constant 0.000000e+00 : f32
    %8 = vector.broadcast %cst_9 : f32 to vector<2x32xf32>
    %c0_10 = arith.constant 0 : index
    %c0_11 = arith.constant 0 : index
    %9 = vector.load %arg10[%c0_10, %c0_11] : memref<16x32xf32, #tpu.memory_space<vmem>>, vector<2x32xf32>
    %cst_12 = arith.constant dense<0.000000e+00> : vector<2x32xf32>
    %10 = tpu.matmul %8, %7, %cst_12 {dimension_numbers = #tpu.dot_dimension_numbers<[1], [0], [0], [1], [0, 0, 1, 1], [], []>} : vector<2x32xf32>, vector<32x32xf32>, vector<2x32xf32> -> vector<2x32xf32>
    %11 = arith.addf %9, %10 : vector<2x32xf32>
    %12 = math.tanh %11 : vector<2x32xf32>
    %c0_13 = arith.constant 0 : index
    %c0_14 = arith.constant 0 : index
    %13 = vector.load %arg11[%c0_13, %c0_14] : memref<16x32xf32, #tpu.memory_space<vmem>>, vector<2x32xf32>
    tpu.vector_store %arg11[%c0_13, %c0_14], %12 {strides = array<i32>} : memref<16x32xf32, #tpu.memory_space<vmem>>, vector<2x32xf32>,
    %c2 = arith.constant 2 : index
    %c0_15 = arith.constant 0 : index
    %14 = vector.load %arg10[%c2, %c0_15] : memref<16x32xf32, #tpu.memory_space<vmem>>, vector<2x32xf32>
    %cst_16 = arith.constant dense<0.000000e+00> : vector<2x32xf32>
    %15 = tpu.matmul %12, %7, %cst_16 {dimension_numbers = #tpu.dot_dimension_numbers<[1], [0], [0], [1], [0, 0, 1, 1], [], []>} : vector<2x32xf32>, vector<32x32xf32>, vector<2x32xf32> -> vector<2x32xf32>
    %16 = arith.addf %14, %15 : vector<2x32xf32>
    %17 = math.tanh %16 : vector<2x32xf32>
    %c2_17 = arith.constant 2 : index
    %c0_18 = arith.constant 0 : index
    %18 = vector.load %arg11[%c2_17, %c0_18] : memref<16x32xf32, #tpu.memory_space<vmem>>, vector<2x32xf32>
    tpu.vector_store %arg11[%c2_17, %c0_18], %17 {strides = array<i32>} : memref<16x32xf32, #tpu.memory_space<vmem>>, vector<2x32xf32>,
    %c4 = arith.constant 4 : index
    %c0_19 = arith.constant 0 : index
    %19 = vector.load %arg10[%c4, %c0_19] : memref<16x32xf32, #tpu.memory_space<vmem>>, vector<2x32xf32>
    %cst_20 = arith.constant dense<0.000000e+00> : vector<2x32xf32>
    %20 = tpu.matmul %17, %7, %cst_20 {dimension_numbers = #tpu.dot_dimension_numbers<[1], [0], [0], [1], [0, 0, 1, 1], [], []>} : vector<2x32xf32>, vector<32x32xf32>, vector<2x32xf32> -> vector<2x32xf32>
    %21 = arith.addf %19, %20 : vector<2x32xf32>
    %22 = math.tanh %21 : vector<2x32xf32>
    %c4_21 = arith.constant 4 : index
    %c0_22 = arith.constant 0 : index
    %23 = vector.load %arg11[%c4_21, %c0_22] : memref<16x32xf32, #tpu.memory_space<vmem>>, vector<2x32xf32>
    tpu.vector_store %arg11[%c4_21, %c0_22], %22 {strides = array<i32>} : memref<16x32xf32, #tpu.memory_space<vmem>>, vector<2x32xf32>,
    %c6 = arith.constant 6 : index
    %c0_23 = arith.constant 0 : index
    %24 = vector.load %arg10[%c6, %c0_23] : memref<16x32xf32, #tpu.memory_space<vmem>>, vector<2x32xf32>
    %cst_24 = arith.constant dense<0.000000e+00> : vector<2x32xf32>
    %25 = tpu.matmul %22, %7, %cst_24 {dimension_numbers = #tpu.dot_dimension_numbers<[1], [0], [0], [1], [0, 0, 1, 1], [], []>} : vector<2x32xf32>, vector<32x32xf32>, vector<2x32xf32> -> vector<2x32xf32>
    %26 = arith.addf %24, %25 : vector<2x32xf32>
    %27 = math.tanh %26 : vector<2x32xf32>
    %c6_25 = arith.constant 6 : index
    %c0_26 = arith.constant 0 : index
    %28 = vector.load %arg11[%c6_25, %c0_26] : memref<16x32xf32, #tpu.memory_space<vmem>>, vector<2x32xf32>
    tpu.vector_store %arg11[%c6_25, %c0_26], %27 {strides = array<i32>} : memref<16x32xf32, #tpu.memory_space<vmem>>, vector<2x32xf32>,
    %c8 = arith.constant 8 : index
    %c0_27 = arith.constant 0 : index
    %29 = vector.load %arg10[%c8, %c0_27] : memref<16x32xf32, #tpu.memory_space<vmem>>, vector<2x32xf32>
    %cst_28 = arith.constant dense<0.000000e+00> : vector<2x32xf32>
    %30 = tpu.matmul %27, %7, %cst_28 {dimension_numbers = #tpu.dot_dimension_numbers<[1], [0], [0], [1], [0, 0, 1, 1], [], []>} : vector<2x32xf32>, vector<32x32xf32>, vector<2x32xf32> -> vector<2x32xf32>
    %31 = arith.addf %29, %30 : vector<2x32xf32>
    %32 = math.tanh %31 : vector<2x32xf32>
    %c8_29 = arith.constant 8 : index
    %c0_30 = arith.constant 0 : index
    %33 = vector.load %arg11[%c8_29, %c0_30] : memref<16x32xf32, #tpu.memory_space<vmem>>, vector<2x32xf32>
    tpu.vector_store %arg11[%c8_29, %c0_30], %32 {strides = array<i32>} : memref<16x32xf32, #tpu.memory_space<vmem>>, vector<2x32xf32>,
    %c10 = arith.constant 10 : index
    %c0_31 = arith.constant 0 : index
    %34 = vector.load %arg10[%c10, %c0_31] : memref<16x32xf32, #tpu.memory_space<vmem>>, vector<2x32xf32>
    %cst_32 = arith.constant dense<0.000000e+00> : vector<2x32xf32>
    %35 = tpu.matmul %32, %7, %cst_32 {dimension_numbers = #tpu.dot_dimension_numbers<[1], [0], [0], [1], [0, 0, 1, 1], [], []>} : vector<2x32xf32>, vector<32x32xf32>, vector<2x32xf32> -> vector<2x32xf32>
    %36 = arith.addf %34, %35 : vector<2x32xf32>
    %37 = math.tanh %36 : vector<2x32xf32>
    %c10_33 = arith.constant 10 : index
    %c0_34 = arith.constant 0 : index
    %38 = vector.load %arg11[%c10_33, %c0_34] : memref<16x32xf32, #tpu.memory_space<vmem>>, vector<2x32xf32>
    tpu.vector_store %arg11[%c10_33, %c0_34], %37 {strides = array<i32>} : memref<16x32xf32, #tpu.memory_space<vmem>>, vector<2x32xf32>,
    %c12 = arith.constant 12 : index
    %c0_35 = arith.constant 0 : index
    %39 = vector.load %arg10[%c12, %c0_35] : memref<16x32xf32, #tpu.memory_space<vmem>>, vector<2x32xf32>
    %cst_36 = arith.constant dense<0.000000e+00> : vector<2x32xf32>
    %40 = tpu.matmul %37, %7, %cst_36 {dimension_numbers = #tpu.dot_dimension_numbers<[1], [0], [0], [1], [0, 0, 1, 1], [], []>} : vector<2x32xf32>, vector<32x32xf32>, vector<2x32xf32> -> vector<2x32xf32>
    %41 = arith.addf %39, %40 : vector<2x32xf32>
    %42 = math.tanh %41 : vector<2x32xf32>
    %c12_37 = arith.constant 12 : index
    %c0_38 = arith.constant 0 : index
    %43 = vector.load %arg11[%c12_37, %c0_38] : memref<16x32xf32, #tpu.memory_space<vmem>>, vector<2x32xf32>
    tpu.vector_store %arg11[%c12_37, %c0_38], %42 {strides = array<i32>} : memref<16x32xf32, #tpu.memory_space<vmem>>, vector<2x32xf32>,
    %c14 = arith.constant 14 : index
    %c0_39 = arith.constant 0 : index
    %44 = vector.load %arg10[%c14, %c0_39] : memref<16x32xf32, #tpu.memory_space<vmem>>, vector<2x32xf32>
    %cst_40 = arith.constant dense<0.000000e+00> : vector<2x32xf32>
    %45 = tpu.matmul %42, %7, %cst_40 {dimension_numbers = #tpu.dot_dimension_numbers<[1], [0], [0], [1], [0, 0, 1, 1], [], []>} : vector<2x32xf32>, vector<32x32xf32>, vector<2x32xf32> -> vector<2x32xf32>
    %46 = arith.addf %44, %45 : vector<2x32xf32>
    %47 = math.tanh %46 : vector<2x32xf32>
    %c14_41 = arith.constant 14 : index
    %c0_42 = arith.constant 0 : index
    %48 = vector.load %arg11[%c14_41, %c0_42] : memref<16x32xf32, #tpu.memory_space<vmem>>, vector<2x32xf32>
    tpu.vector_store %arg11[%c14_41, %c0_42], %47 {strides = array<i32>} : memref<16x32xf32, #tpu.memory_space<vmem>>, vector<2x32xf32>,
    %c0_43 = arith.constant 0 : index
    %c0_44 = arith.constant 0 : index
    %49 = vector.load %arg11[%c0_43, %c0_44] : memref<16x32xf32, #tpu.memory_space<vmem>>, vector<16x32xf32>
    %c0_45 = arith.constant 0 : index
    %c0_46 = arith.constant 0 : index
    %50 = vector.load %arg4[%c0_45, %c0_46] : memref<32x32xf32, #tpu.memory_space<vmem>>, vector<32x32xf32>
    %cst_47 = arith.constant dense<0.000000e+00> : vector<16x32xf32>
    %51 = tpu.matmul %49, %50, %cst_47 {dimension_numbers = #tpu.dot_dimension_numbers<[1], [0], [0], [1], [0, 0, 1, 1], [], []>} : vector<16x32xf32>, vector<32x32xf32>, vector<16x32xf32> -> vector<16x32xf32>
    %c0_48 = arith.constant 0 : index
    %c0_49 = arith.constant 0 : index
    %52 = vector.load %arg6[%c0_48, %c0_49] : memref<1x32xf32, #tpu.memory_space<vmem>>, vector<1x32xf32>
    %53 = vector.broadcast %52 : vector<1x32xf32> to vector<16x32xf32>
    %54 = arith.addf %51, %53 : vector<16x32xf32>
    %c0_50 = arith.constant 0 : index
    %c0_51 = arith.constant 0 : index
    %55 = vector.load %arg10[%c0_50, %c0_51] : memref<16x32xf32, #tpu.memory_space<vmem>>, vector<16x32xf32>
    tpu.vector_store %arg10[%c0_50, %c0_51], %54 {strides = array<i32>} : memref<16x32xf32, #tpu.memory_space<vmem>>, vector<16x32xf32>,
    %c0_52 = arith.constant 0 : index
    %c0_53 = arith.constant 0 : index
    %56 = vector.load %arg5[%c0_52, %c0_53] : memref<32x32xf32, #tpu.memory_space<vmem>>, vector<32x32xf32>
    %cst_54 = arith.constant 0.000000e+00 : f32
    %57 = vector.broadcast %cst_54 : f32 to vector<2x32xf32>
    %c0_55 = arith.constant 0 : index
    %c0_56 = arith.constant 0 : index
    %58 = vector.load %arg10[%c0_55, %c0_56] : memref<16x32xf32, #tpu.memory_space<vmem>>, vector<2x32xf32>
    %cst_57 = arith.constant dense<0.000000e+00> : vector<2x32xf32>
    %59 = tpu.matmul %57, %56, %cst_57 {dimension_numbers = #tpu.dot_dimension_numbers<[1], [0], [0], [1], [0, 0, 1, 1], [], []>} : vector<2x32xf32>, vector<32x32xf32>, vector<2x32xf32> -> vector<2x32xf32>
    %60 = arith.addf %58, %59 : vector<2x32xf32>
    %61 = math.tanh %60 : vector<2x32xf32>
    %c2_58 = arith.constant 2 : index
    %c0_59 = arith.constant 0 : index
    %62 = vector.load %arg10[%c2_58, %c0_59] : memref<16x32xf32, #tpu.memory_space<vmem>>, vector<2x32xf32>
    %cst_60 = arith.constant dense<0.000000e+00> : vector<2x32xf32>
    %63 = tpu.matmul %61, %56, %cst_60 {dimension_numbers = #tpu.dot_dimension_numbers<[1], [0], [0], [1], [0, 0, 1, 1], [], []>} : vector<2x32xf32>, vector<32x32xf32>, vector<2x32xf32> -> vector<2x32xf32>
    %64 = arith.addf %62, %63 : vector<2x32xf32>
    %65 = math.tanh %64 : vector<2x32xf32>
    %c4_61 = arith.constant 4 : index
    %c0_62 = arith.constant 0 : index
    %66 = vector.load %arg10[%c4_61, %c0_62] : memref<16x32xf32, #tpu.memory_space<vmem>>, vector<2x32xf32>
    %cst_63 = arith.constant dense<0.000000e+00> : vector<2x32xf32>
    %67 = tpu.matmul %65, %56, %cst_63 {dimension_numbers = #tpu.dot_dimension_numbers<[1], [0], [0], [1], [0, 0, 1, 1], [], []>} : vector<2x32xf32>, vector<32x32xf32>, vector<2x32xf32> -> vector<2x32xf32>
    %68 = arith.addf %66, %67 : vector<2x32xf32>
    %69 = math.tanh %68 : vector<2x32xf32>
    %c6_64 = arith.constant 6 : index
    %c0_65 = arith.constant 0 : index
    %70 = vector.load %arg10[%c6_64, %c0_65] : memref<16x32xf32, #tpu.memory_space<vmem>>, vector<2x32xf32>
    %cst_66 = arith.constant dense<0.000000e+00> : vector<2x32xf32>
    %71 = tpu.matmul %69, %56, %cst_66 {dimension_numbers = #tpu.dot_dimension_numbers<[1], [0], [0], [1], [0, 0, 1, 1], [], []>} : vector<2x32xf32>, vector<32x32xf32>, vector<2x32xf32> -> vector<2x32xf32>
    %72 = arith.addf %70, %71 : vector<2x32xf32>
    %73 = math.tanh %72 : vector<2x32xf32>
    %c8_67 = arith.constant 8 : index
    %c0_68 = arith.constant 0 : index
    %74 = vector.load %arg10[%c8_67, %c0_68] : memref<16x32xf32, #tpu.memory_space<vmem>>, vector<2x32xf32>
    %cst_69 = arith.constant dense<0.000000e+00> : vector<2x32xf32>
    %75 = tpu.matmul %73, %56, %cst_69 {dimension_numbers = #tpu.dot_dimension_numbers<[1], [0], [0], [1], [0, 0, 1, 1], [], []>} : vector<2x32xf32>, vector<32x32xf32>, vector<2x32xf32> -> vector<2x32xf32>
    %76 = arith.addf %74, %75 : vector<2x32xf32>
    %77 = math.tanh %76 : vector<2x32xf32>
    %c10_70 = arith.constant 10 : index
    %c0_71 = arith.constant 0 : index
    %78 = vector.load %arg10[%c10_70, %c0_71] : memref<16x32xf32, #tpu.memory_space<vmem>>, vector<2x32xf32>
    %cst_72 = arith.constant dense<0.000000e+00> : vector<2x32xf32>
    %79 = tpu.matmul %77, %56, %cst_72 {dimension_numbers = #tpu.dot_dimension_numbers<[1], [0], [0], [1], [0, 0, 1, 1], [], []>} : vector<2x32xf32>, vector<32x32xf32>, vector<2x32xf32> -> vector<2x32xf32>
    %80 = arith.addf %78, %79 : vector<2x32xf32>
    %81 = math.tanh %80 : vector<2x32xf32>
    %c12_73 = arith.constant 12 : index
    %c0_74 = arith.constant 0 : index
    %82 = vector.load %arg10[%c12_73, %c0_74] : memref<16x32xf32, #tpu.memory_space<vmem>>, vector<2x32xf32>
    %cst_75 = arith.constant dense<0.000000e+00> : vector<2x32xf32>
    %83 = tpu.matmul %81, %56, %cst_75 {dimension_numbers = #tpu.dot_dimension_numbers<[1], [0], [0], [1], [0, 0, 1, 1], [], []>} : vector<2x32xf32>, vector<32x32xf32>, vector<2x32xf32> -> vector<2x32xf32>
    %84 = arith.addf %82, %83 : vector<2x32xf32>
    %85 = math.tanh %84 : vector<2x32xf32>
    %c14_76 = arith.constant 14 : index
    %c0_77 = arith.constant 0 : index
    %86 = vector.load %arg10[%c14_76, %c0_77] : memref<16x32xf32, #tpu.memory_space<vmem>>, vector<2x32xf32>
    %cst_78 = arith.constant dense<0.000000e+00> : vector<2x32xf32>
    %87 = tpu.matmul %85, %56, %cst_78 {dimension_numbers = #tpu.dot_dimension_numbers<[1], [0], [0], [1], [0, 0, 1, 1], [], []>} : vector<2x32xf32>, vector<32x32xf32>, vector<2x32xf32> -> vector<2x32xf32>
    %88 = arith.addf %86, %87 : vector<2x32xf32>
    %89 = math.tanh %88 : vector<2x32xf32>
    %c0_79 = arith.constant 0 : index
    %c0_80 = arith.constant 0 : index
    %90 = vector.load %arg7[%c0_79, %c0_80] : memref<32x4xf32, #tpu.memory_space<vmem>>, vector<32x4xf32>
    %cst_81 = arith.constant dense<0.000000e+00> : vector<2x4xf32>
    %91 = tpu.matmul %89, %90, %cst_81 {dimension_numbers = #tpu.dot_dimension_numbers<[1], [0], [0], [1], [0, 0, 1, 1], [], []>} : vector<2x32xf32>, vector<32x4xf32>, vector<2x4xf32> -> vector<2x4xf32>
    %c0_82 = arith.constant 0 : index
    %c0_83 = arith.constant 0 : index
    %92 = vector.load %arg8[%c0_82, %c0_83] : memref<1x4xf32, #tpu.memory_space<vmem>>, vector<1x4xf32>
    %93 = vector.broadcast %92 : vector<1x4xf32> to vector<2x4xf32>
    %94 = arith.addf %91, %93 : vector<2x4xf32>
    %c0_84 = arith.constant 0 : index
    %c0_85 = arith.constant 0 : index
    %95 = vector.load %arg9[%c0_84, %c0_85] : memref<2x4xf32, #tpu.memory_space<vmem>>, vector<2x4xf32>
    tpu.vector_store %arg9[%c0_84, %c0_85], %94 {strides = array<i32>} : memref<2x4xf32, #tpu.memory_space<vmem>>, vector<2x4xf32>,
    return
  }
}

</mosaic_0001>

<bundles_post_ra>
// kernel: rnn_forward.1
= control target key start
LH: loop header
LB: loop body
LE: loop exit
PB: predicated region body
PF: predicated region fallthrough
CT: control target
= control target key end

     0   :  { %14 = vsyncpa [#allocation5], 0  ;;  %s949_s0 = inlined_call_operand.vmem [shape: f32[16,16], index: 0, kind: input, shape index: {}]   ;;  %s950_s1 = inlined_call_operand.hbm [shape: f32[16,32], index: 1, kind: input, shape index: {}]   ;;  %s951_s2 = inlined_call_operand.vmem [shape: f32[32,32], index: 2, kind: input, shape index: {}]   ;;  %s952_s3 = inlined_call_operand.vmem [shape: f32[1,32], index: 3, kind: input, shape index: {}]   ;;  %s953_s4 = inlined_call_operand.vmem [shape: f32[32,32], index: 4, kind: input, shape index: {}]   ;;  %s954_s5 = inlined_call_operand.hbm [shape: f32[32,32], index: 5, kind: input, shape index: {}]   ;;  %s955_s6 = inlined_call_operand.vmem [shape: f32[1,32], index: 6, kind: input, shape index: {}]   ;;  %s956_s7 = inlined_call_operand.vmem [shape: f32[32,4], index: 7, kind: input, shape index: {}]   ;;  %s957_s8 = inlined_call_operand.vmem [shape: f32[1,4], index: 8, kind: input, shape index: {}]   ;;  %s958_s9 = inlined_call_operand.hbm [shape: f32[2,4], index: 9, kind: output, shape index: {}]  }
   0x1   :  { %15 = vsyncpa [#allocation8], 0 }
   0x2   :  { %16 = vsyncpa [#allocation6], 0  ;;  %s23_s11 = sshll.u32 %s950_s1, 4  ;;  %s766_s12 = smov [#allocation4]   ;;  %s24_s11 = int_to_ptr.hbm [resolvable:$true] %s23_s11 }
   0x3   :  { %s25_s13 = sshll.u32 %s766_s12, 4  ;;  %s42_s16 = sshll.u32 %s954_s5, 4  ;;  %s26_s13 = int_to_ptr.vmem [resolvable:$true] %s25_s13  ;;  %s43_s16 = int_to_ptr.hbm [resolvable:$true] %s42_s16 }
   0x4   :  { %s767_s17 = smov 128   ;;  %s768_s18 = smov 8  }
   0x5   :  { %31 = dma.hbm_to_vmem [thread:$0]  %s24_s11, 256, %s26_s13, [#allocation5], %s767_s17, %s767_s17, %s768_s18  }
   0x6   :  { %s769_s19 = smov [#allocation7]  }
   0x7   :  { %s44_s20 = sshll.u32 %s769_s19, 4  ;;  %s45_s20 = int_to_ptr.vmem [resolvable:$true] %s44_s20 }
   0x8   :  { %50 = dma.hbm_to_vmem [thread:$0]  %s43_s16, 512, %s45_s20, [#allocation8], %s767_s17, %s767_s17, %s768_s18  }
   0x9   :  { %760 = dma.done.wait [#allocation5], 256  }
   0xa   :  { %761 = vsyncadd [#allocation5], 4294967040 }
   0xb   :  { %762 = dma.done.wait [#allocation8], 512  }
   0xc   :  { %763 = vsyncadd [#allocation8], 4294966784  ;;  %v68_v0 = vld [vmem:[#allocation4 + $0x8] sm:$0xff]  ;;  %v67_v1 = vld [vmem:[#allocation4] sm:$0xff]  ;;  %vm73_vm0 = vcmask 130048   ;;  %v770_v7 = vmov 0.0  }
   0xd   :  { %94 = vmatpush.msra.mxu0 %v68_v0  ;;  %v65_v2 = vld [vmem:[%s949_s0] sm:$0xff]  ;;  %v109_v3 = vld [vmem:[%s951_s2 + $0x18] sm:$0xff]  ;;  %v108_v4 = vld [vmem:[%s951_s2 + $0x10] sm:$0xff]  ;;  %vm103_vm1 = vcmask 261120   ;;  %vm136_vm2 = vcmask 254976   ;;  %s771_s25 = smov [#allocation9]  }
   0xe   :  { %126 = vmatpush.msra.mxu1 %v109_v3  ;;  %154 = vmatpush.msra.mxu2 %v109_v3  ;;  %v107_v5 = vld [vmem:[%s951_s2 + $0x8] sm:$0xff]  ;;  %v106_v6 = vld [vmem:[%s951_s2] sm:$0xff]  ;;  %v332_v24 = vld [vmem:[%s953_s4 + $0x18] sm:$0xff]  ;;  %s615_s26 = sshll.u32 %s771_s25, 4  ;;  %s617_s2 = sshll.u32 %s958_s9, 4  ;;  %vm608_vm3 = vcmask 25600   ;;  %s616_s26 = int_to_ptr.vmem [resolvable:$true] %s615_s26  ;;  %s618_s2 = int_to_ptr.hbm [resolvable:$true] %s617_s2 }
   0xf   :  { %95 = vmatpush.msra.mxu0 %v67_v1  ;;  %181 = vmatpush.msra.mxu3 %v109_v3  ;;  %v653_v8 = vld [vmem:[%s952_s3] ss:$0 sm:$0xff]  ;;  %v66_v23 = vld [vmem:[%s949_s0 + $0x8] sm:$0xff]  ;;  %v331_v25 = vld [vmem:[%s953_s4 + $0x10] sm:$0xff] }
  0x10   :  { %628 = vmatmul.msk.f32.vlgmr.msra.gmra.mxu0 %vm73_vm0, %v65_v2  ;;  %127 = vmatpush.msra.mxu1 %v108_v4  ;;  %v330_v26 = vld [vmem:[%s953_s4 + $0x8] sm:$0xff]  ;;  %v329_v27 = vld [vmem:[%s953_s4] sm:$0xff]  ;;  %v881_v37 = vld [vmem:[#allocation7 + $0x8] sm:$0xff] }
  0x11   :  { %155 = vmatpush.msra.mxu2 %v108_v4  ;;  %182 = vmatpush.msra.mxu3 %v108_v4  ;;  %v875_v35 = vld [vmem:[#allocation7 + $0x18] sm:$0xff]  ;;  %v877_v36 = vld [vmem:[#allocation7 + $0x10] sm:$0xff]  ;;  %v368_v38 = vld [vmem:[#allocation7] sm:$0xff] }
  0x12   :  { %128 = vmatpush.msra.mxu1 %v107_v5  ;;  %289 = vmatpush.msrb.mxu0 %v109_v3  ;;  %v896_v42 = vld [vmem:[%s955_s6] ss:$0 sm:$0xff] }
  0x13   :  { %156 = vmatpush.msra.mxu2 %v107_v5  ;;  %183 = vmatpush.msra.mxu3 %v107_v5 }
  0x14   :  { %129 = vmatpush.msra.mxu1 %v106_v6  ;;  %290 = vmatpush.msrb.mxu0 %v108_v4 }
  0x15   :  { %130 = vmatmul.f32.vlgmr.msra.gmra.mxu1 %v770_v7  ;;  %157 = vmatpush.msra.mxu2 %v106_v6 }
  0x16   :  { %184 = vmatpush.msra.mxu3 %v106_v6  ;;  %208 = vmatpush.msrb.mxu1 %v109_v3 }
  0x17   :  { %235 = vmatpush.msrb.mxu2 %v109_v3  ;;  %291 = vmatpush.msrb.mxu0 %v107_v5 }
  0x18   :  { %262 = vmatpush.msrb.mxu3 %v109_v3  ;;  %209 = vmatpush.msrb.mxu1 %v108_v4 }
  0x19   :  { %236 = vmatpush.msrb.mxu2 %v108_v4  ;;  %292 = vmatpush.msrb.mxu0 %v106_v6 }
  0x1a   :  { %263 = vmatpush.msrb.mxu3 %v108_v4  ;;  %210 = vmatpush.msrb.mxu1 %v107_v5 }
  0x1b   :  { %237 = vmatpush.msrb.mxu2 %v107_v5  ;;  %629 = vmatmul.msk.f32.gmra.mxu0 %vm73_vm0, %v66_v23 }
  0x1c   :  { %264 = vmatpush.msrb.mxu3 %v107_v5  ;;  %211 = vmatpush.msrb.mxu1 %v106_v6 }
  0x1d   :  { %238 = vmatpush.msrb.mxu2 %v106_v6  ;;  %411 = vmatpush.msra.mxu0 %v875_v35 }
  0x1e   :  { %265 = vmatpush.msrb.mxu3 %v106_v6  ;;  %316 = vmatpush.msra.mxu1 %v109_v3 }
  0x1f   :  { %412 = vmatpush.msra.mxu0 %v877_v36 }
  0x20   :  { %317 = vmatpush.msra.mxu1 %v108_v4 }
  0x21   :  { %413 = vmatpush.msra.mxu0 %v881_v37 }
  0x22   :  { %318 = vmatpush.msra.mxu1 %v107_v5 }
  0x23   :  { %414 = vmatpush.msra.mxu0 %v368_v38 }
  0x24   :  { %319 = vmatpush.msra.mxu1 %v106_v6 }
  0x8d   :  { %v97_v9 = vpop.f32.mrf.mxu0 }
  0x8e   :  { %v98_v10 = vadd.f32 %v653_v8, %v97_v9 }
  0x90   :  { %104 = vst.msk [vmem:[#allocation2] sm:$0xff] %vm103_vm1, %v98_v10 }
  0x92   :  { %v131_v11 = vpop.f32.mrf.mxu1 }
  0x97   :  { %v110_v12 = vld [vmem:[#allocation2] sm:$0x3]  ;;  %v138_v15 = vld [vmem:[#allocation2 + $0x2] sm:$0x3]  ;;  %v165_v19 = vld [vmem:[#allocation2 + $0x4] sm:$0x3] }
  0x98   :  { %v134_v13 = vadd.f32 %v131_v11, %v110_v12  ;;  %v192_v28 = vld [vmem:[#allocation2 + $0x6] sm:$0x3]  ;;  %v100_v33 = vpop.f32.mrf.mxu0 }
  0x99   :  { %v101_v34 = vadd.f32 %v653_v8, %v100_v33  ;;  %v655_v33 = vld [vmem:[%s957_s8] ss:$0 sm:$0xff] }
  0x9a   :  { %656 = vtanh.f32 %v134_v13 }
  0x9b   :  { %105 = vst.msk [vmem:[#allocation2 + $0x8] sm:$0xff] %vm103_vm1, %v101_v34 }
  0xa0   :  { %v657_v14 = vpop.eup %656 }
  0xa1   :  { %137 = vst.msk [vmem:[#allocation3] sm:$0x3] %vm136_vm2, %v657_v14  ;;  %630 = vmatmul.msk.f32.vlgmr.msra.gmra.mxu2 %vm103_vm1, %v657_v14 }
  0xa2   :  { %355 = vmatpush.msra.mxu2 %v332_v24  ;;  %v219_v39 = vld [vmem:[#allocation2 + $0x8] sm:$0x3]  ;;  %v246_v46 = vld [vmem:[#allocation2 + $0xa] sm:$0x3]  ;;  %v273_v54 = vld [vmem:[#allocation2 + $0xc] sm:$0x3] }
  0xa3   :  { %v300_v62 = vld [vmem:[#allocation2 + $0xe] sm:$0x3] }
  0xa4   :  { %356 = vmatpush.msra.mxu2 %v331_v25  ;;  %v580_v25 = vld [vmem:[%s956_s7 + $0x18] sm:$0xff] }
  0xa6   :  { %357 = vmatpush.msra.mxu2 %v330_v26  ;;  %v579_v26 = vld [vmem:[%s956_s7 + $0x10] sm:$0xff] }
  0xa8   :  { %358 = vmatpush.msra.mxu2 %v329_v27  ;;  %v578_v27 = vld [vmem:[%s956_s7 + $0x8] sm:$0xff] }
 0x124   :  { %v159_v16 = vpop.f32.mrf.mxu2 }
 0x125   :  { %v162_v17 = vadd.f32 %v159_v16, %v138_v15 }
 0x127   :  { %658 = vtanh.f32 %v162_v17 }
 0x12d   :  { %v659_v18 = vpop.eup %658 }
 0x12e   :  { %164 = vst.msk [vmem:[#allocation3 + $0x2] sm:$0x3] %vm136_vm2, %v659_v18  ;;  %631 = vmatmul.msk.f32.vlgmr.msra.gmra.mxu3 %vm103_vm1, %v659_v18 }
 0x12f   :  { %385 = vmatpush.msra.mxu3 %v875_v35 }
 0x131   :  { %386 = vmatpush.msra.mxu3 %v877_v36 }
 0x133   :  { %387 = vmatpush.msra.mxu3 %v881_v37 }
 0x135   :  { %388 = vmatpush.msra.mxu3 %v368_v38 }
 0x1b1   :  { %v186_v20 = vpop.f32.mrf.mxu3 }
 0x1b2   :  { %v189_v21 = vadd.f32 %v186_v20, %v165_v19 }
 0x1b4   :  { %660 = vtanh.f32 %v189_v21 }
 0x1ba   :  { %v661_v22 = vpop.eup %660 }
 0x1bb   :  { %191 = vst.msk [vmem:[#allocation3 + $0x4] sm:$0x3] %vm136_vm2, %v661_v22  ;;  %632 = vmatmul.msk.f32.vlgmr.msrb.gmra.mxu1 %vm103_vm1, %v661_v22 }
 0x1bc   :  { %437 = vmatpush.msrb.mxu1 %v875_v35 }
 0x1be   :  { %438 = vmatpush.msrb.mxu1 %v877_v36 }
 0x1c0   :  { %439 = vmatpush.msrb.mxu1 %v881_v37 }
 0x1c2   :  { %440 = vmatpush.msrb.mxu1 %v368_v38 }
 0x238   :  { %v213_v29 = vpop.f32.mrf.mxu1 }
 0x239   :  { %v216_v30 = vadd.f32 %v213_v29, %v192_v28  ;;  %v577_v28 = vld [vmem:[%s956_s7] sm:$0xff] }
 0x23b   :  { %662 = vtanh.f32 %v216_v30 }
 0x241   :  { %v663_v31 = vpop.eup %662 }
 0x242   :  { %218 = vst.msk [vmem:[#allocation3 + $0x6] sm:$0x3] %vm136_vm2, %v663_v31  ;;  %633 = vmatmul.msk.f32.vlgmr.msrb.gmra.mxu2 %vm103_vm1, %v663_v31 }
 0x243   :  { %541 = vmatpush.msrb.mxu2 %v875_v35 }
 0x245   :  { %542 = vmatpush.msrb.mxu2 %v877_v36 }
 0x247   :  { %543 = vmatpush.msrb.mxu2 %v881_v37 }
 0x249   :  { %v327_v32 = vld [vmem:[#allocation3] sm:$0xff]  ;;  %544 = vmatpush.msrb.mxu2 %v368_v38 }
 0x24a   :  { %637 = vmatmul.msk.f32.vlgmr.msra.gmra.mxu2 %vm103_vm1, %v327_v32 }
 0x2c5   :  { %v240_v40 = vpop.f32.mrf.mxu2 }
 0x2c6   :  { %v243_v41 = vadd.f32 %v240_v40, %v219_v39 }
 0x2c8   :  { %664 = vtanh.f32 %v243_v41 }
 0x2cd   :  { %v360_v43 = vpop.f32.mrf.mxu2 }
 0x2ce   :  { %v665_v44 = vpop.eup %664  ;;  %v361_v45 = vadd.f32 %v896_v42, %v360_v43 }
 0x2cf   :  { %245 = vst.msk [vmem:[#allocation3 + $0x8] sm:$0x3] %vm136_vm2, %v665_v44  ;;  %634 = vmatmul.msk.f32.vlgmr.msrb.gmra.mxu3 %vm103_vm1, %v665_v44 }
 0x2d0   :  { %366 = vst.msk [vmem:[#allocation2] sm:$0xff] %vm103_vm1, %v361_v45  ;;  %463 = vmatpush.msrb.mxu3 %v875_v35 }
 0x2d2   :  { %464 = vmatpush.msrb.mxu3 %v877_v36 }
 0x2d4   :  { %465 = vmatpush.msrb.mxu3 %v881_v37 }
 0x2d6   :  { %466 = vmatpush.msrb.mxu3 %v368_v38 }
 0x2d7   :  { %389 = vmatmul.f32.vlgmr.msra.gmra.mxu3 %v770_v7  ;;  %v372_v49 = vld [vmem:[#allocation2] sm:$0x3]  ;;  %v395_v57 = vld [vmem:[#allocation2 + $0x2] sm:$0x3]  ;;  %v421_v1 = vld [vmem:[#allocation2 + $0x4] sm:$0x3] }
 0x2d8   :  { %567 = vmatpush.msra.mxu3 %v875_v35  ;;  %v447_v8 = vld [vmem:[#allocation2 + $0x6] sm:$0x3] }
 0x2da   :  { %568 = vmatpush.msra.mxu3 %v877_v36 }
 0x2dc   :  { %569 = vmatpush.msra.mxu3 %v881_v37 }
 0x2de   :  { %570 = vmatpush.msra.mxu3 %v368_v38 }
 0x352   :  { %v267_v47 = vpop.f32.mrf.mxu3 }
 0x353   :  { %v270_v48 = vadd.f32 %v267_v47, %v246_v46 }
 0x355   :  { %666 = vtanh.f32 %v270_v48 }
 0x35a   :  { %v390_v50 = vpop.f32.mrf.mxu3 }
 0x35b   :  { %v667_v51 = vpop.eup %666  ;;  %v393_v52 = vadd.f32 %v390_v50, %v372_v49 }
 0x35c   :  { %272 = vst.msk [vmem:[#allocation3 + $0xa] sm:$0x3] %vm136_vm2, %v667_v51  ;;  %635 = vmatmul.msk.f32.vlgmr.msrb.gmra.mxu0 %vm103_vm1, %v667_v51 }
 0x35d   :  { %668 = vtanh.f32 %v393_v52  ;;  %489 = vmatpush.msrb.mxu0 %v875_v35 }
 0x35f   :  { %490 = vmatpush.msrb.mxu0 %v877_v36 }
 0x361   :  { %491 = vmatpush.msrb.mxu0 %v881_v37 }
 0x363   :  { %v669_v53 = vpop.eup %668  ;;  %492 = vmatpush.msrb.mxu0 %v368_v38 }
 0x364   :  { %639 = vmatmul.msk.f32.vlgmr.msra.gmra.mxu0 %vm103_vm1, %v669_v53 }
 0x365   :  { %600 = vmatpush.msra.mxu0 %v580_v25 }
 0x367   :  { %601 = vmatpush.msra.mxu0 %v579_v26 }
 0x369   :  { %602 = vmatpush.msra.mxu0 %v578_v27 }
 0x36b   :  { %603 = vmatpush.msra.mxu0 %v577_v28 }
 0x3d9   :  { %v294_v55 = vpop.f32.mrf.mxu0 }
 0x3da   :  { %v297_v56 = vadd.f32 %v294_v55, %v273_v54 }
 0x3dc   :  { %670 = vtanh.f32 %v297_v56 }
 0x3e1   :  { %v416_v58 = vpop.f32.mrf.mxu0 }
 0x3e2   :  { %v671_v59 = vpop.eup %670  ;;  %v419_v60 = vadd.f32 %v416_v58, %v395_v57 }
 0x3e3   :  { %299 = vst.msk [vmem:[#allocation3 + $0xc] sm:$0x3] %vm136_vm2, %v671_v59  ;;  %636 = vmatmul.msk.f32.vlgmr.msra.gmra.mxu1 %vm103_vm1, %v671_v59 }
 0x3e4   :  { %672 = vtanh.f32 %v419_v60  ;;  %515 = vmatpush.msra.mxu1 %v875_v35 }
 0x3e6   :  { %516 = vmatpush.msra.mxu1 %v877_v36 }
 0x3e8   :  { %517 = vmatpush.msra.mxu1 %v881_v37 }
 0x3ea   :  { %v673_v61 = vpop.eup %672  ;;  %518 = vmatpush.msra.mxu1 %v368_v38 }
 0x3eb   :  { %640 = vmatmul.msk.f32.vlgmr.msrb.gmra.mxu1 %vm103_vm1, %v673_v61 }
 0x460   :  { %v321_v63 = vpop.f32.mrf.mxu1 }
 0x461   :  { %v324_v0 = vadd.f32 %v321_v63, %v300_v62 }
 0x463   :  { %674 = vtanh.f32 %v324_v0 }
 0x468   :  { %v442_v2 = vpop.f32.mrf.mxu1 }
 0x469   :  { %v675_v3 = vpop.eup %674  ;;  %v445_v4 = vadd.f32 %v442_v2, %v421_v1 }
 0x46a   :  { %326 = vst.msk [vmem:[#allocation3 + $0xe] sm:$0x3] %vm136_vm2, %v675_v3 }
 0x46b   :  { %676 = vtanh.f32 %v445_v4 }
 0x471   :  { %v677_v5 = vpop.eup %676  ;;  %v328_v6 = vld [vmem:[#allocation3 + $0x8] sm:$0xff] }
 0x472   :  { %638 = vmatmul.msk.f32.gmra.mxu2 %vm103_vm1, %v328_v6  ;;  %641 = vmatmul.msk.f32.vlgmr.msrb.gmra.mxu3 %vm103_vm1, %v677_v5 }
 0x4f5   :  { %v363_v7 = vpop.f32.mrf.mxu2  ;;  %v468_v9 = vpop.f32.mrf.mxu3 }
 0x4f6   :  { %v364_v10 = vadd.f32 %v896_v42, %v363_v7  ;;  %v471_v11 = vadd.f32 %v468_v9, %v447_v8 }
 0x4f8   :  { %367 = vst.msk [vmem:[#allocation2 + $0x8] sm:$0xff] %vm103_vm1, %v364_v10  ;;  %678 = vtanh.f32 %v471_v11 }
 0x4fe   :  { %v679_v12 = vpop.eup %678 }
 0x4ff   :  { %642 = vmatmul.msk.f32.vlgmr.msrb.gmra.mxu0 %vm103_vm1, %v679_v12  ;;  %v473_v13 = vld [vmem:[#allocation2 + $0x8] sm:$0x3]  ;;  %v499_v17 = vld [vmem:[#allocation2 + $0xa] sm:$0x3]  ;;  %v525_v21 = vld [vmem:[#allocation2 + $0xc] sm:$0x3] }
 0x500   :  { %v551_v29 = vld [vmem:[#allocation2 + $0xe] sm:$0x3] }
 0x57c   :  { %v494_v14 = vpop.f32.mrf.mxu0 }
 0x57d   :  { %v497_v15 = vadd.f32 %v494_v14, %v473_v13 }
 0x57f   :  { %680 = vtanh.f32 %v497_v15 }
 0x585   :  { %v681_v16 = vpop.eup %680 }
 0x586   :  { %643 = vmatmul.msk.f32.vlgmr.msra.gmra.mxu1 %vm103_vm1, %v681_v16 }
 0x603   :  { %v520_v18 = vpop.f32.mrf.mxu1 }
 0x604   :  { %v523_v19 = vadd.f32 %v520_v18, %v499_v17 }
 0x606   :  { %682 = vtanh.f32 %v523_v19 }
 0x60c   :  { %v683_v20 = vpop.eup %682 }
 0x60d   :  { %644 = vmatmul.msk.f32.vlgmr.msrb.gmra.mxu2 %vm103_vm1, %v683_v20 }
 0x690   :  { %v546_v22 = vpop.f32.mrf.mxu2 }
 0x691   :  { %v549_v23 = vadd.f32 %v546_v22, %v525_v21 }
 0x693   :  { %684 = vtanh.f32 %v549_v23 }
 0x699   :  { %v685_v24 = vpop.eup %684 }
 0x69a   :  { %645 = vmatmul.msk.f32.vlgmr.msra.gmra.mxu3 %vm103_vm1, %v685_v24 }
 0x71d   :  { %v572_v30 = vpop.f32.mrf.mxu3 }
 0x71e   :  { %v575_v31 = vadd.f32 %v572_v30, %v551_v29 }
 0x720   :  { %686 = vtanh.f32 %v575_v31 }
 0x726   :  { %v687_v32 = vpop.eup %686 }
 0x727   :  { %646 = vmatmul.msk.f32.vlgmr.msra.gmra.mxu0 %vm103_vm1, %v687_v32 }
 0x7a4   :  { %v605_v34 = vpop.f32.mrf.mxu0 }
 0x7a5   :  { %v606_v35 = vadd.f32 %v655_v33, %v605_v34 }
 0x7a7   :  { %609 = vst.msk [vmem:[#allocation9] sm:$0x3] %vm608_vm3, %v606_v35 }
 0x7a8   :  { %620 = dma.vmem_to_hbm [thread:$0]  %s616_s26, 32, %s618_s2, [#allocation6]  }
 0x7a9   :  { %764 = dma.done.wait [#allocation6], 32  }
 0x7aa   :  { %765 = vsyncadd [#allocation6], 4294967264 }
 0x7ab   :  { %625 = vsyncpa [#allocation5], 1 }
 0x7ac   :  { %626 = vsyncpa [#allocation8], 1 }
 0x7ad   :  { %627 = vsyncpa [#allocation6], 1 }

</bundles_post_ra>
